<compile_context>
chip_gen: v6e
topology: v6e:2x2x1
jax: 0.10.0
libtpu: 0.0.40
codegen_flags: <defaults>
</compile_context>

<pallas_src>
import functools

import jax
import jax.numpy as jnp
from jax.experimental import pallas as pl
from jax.experimental.pallas import tpu as pltpu


# ----------------------------------------------------------------------------
# Path 1: batched single-pass kernel (whole (C, HW) slab per batch element).
# ----------------------------------------------------------------------------
def _se_kernel(x_ref, w1t_ref, w2t_ref, o_ref, *, inv_hw):
    # x_ref  : (Bt, C, HW)   full spatial extent (no lane padding)
    # w1t_ref: (C, hidden)   W1^T  (first Linear, bias=False), f32
    # w2t_ref: (hidden, C)   W2^T  (second Linear, bias=False), f32

    # 'b c h w -> b c' mean: f32 sum over the lane axis / true HW.
    s = jnp.sum(x_ref[...], axis=-1, dtype=jnp.float32)                # (Bt, C)
    mean = s * inv_hw                                                  # (Bt, C)

    # Linear(dim -> hidden) + SiLU, then Linear(hidden -> dim) + sigmoid.
    h = jnp.dot(mean, w1t_ref[...], preferred_element_type=jnp.float32)
    h = h * jax.nn.sigmoid(h)
    g = jax.nn.sigmoid(jnp.dot(h, w2t_ref[...],
                               preferred_element_type=jnp.float32))    # (Bt, C)

    # Apply the gate in the x dtype (keeps the store pass in bf16 on v6e/v7x).
    g = g.astype(o_ref.dtype)
    o_ref[...] = x_ref[...] * g[:, :, None]


# ----------------------------------------------------------------------------
# Path 2 (fallback for huge slabs): HW-tiled gate pass + HW-tiled apply pass.
# ----------------------------------------------------------------------------
def _se_gate_kernel(x_ref, w1t_ref, w2t_ref, g_ref, sum_ref,
                    *, inv_hw, hw, hw_tile):
    # x_ref: (1, C, hw_tile); g_ref: (1, 1, C) f32; sum_ref: (1, C) f32 scratch
    h_idx = pl.program_id(1)

    @pl.when(h_idx == 0)
    def _():
        sum_ref[...] = jnp.zeros_like(sum_ref)

    # Mask the (possibly ragged) last HW tile so garbage lanes do not bias the sum.
    lane = h_idx * hw_tile + jax.lax.broadcasted_iota(jnp.int32, x_ref.shape, 2)
    xb = jnp.where(lane < hw, x_ref[...].astype(jnp.float32), 0.0)
    sum_ref[...] += jnp.sum(xb, axis=-1)

    @pl.when(h_idx == pl.num_programs(1) - 1)
    def _():
        mean = sum_ref[...] * inv_hw                                   # (1, C)
        hid = jnp.dot(mean, w1t_ref[...], preferred_element_type=jnp.float32)
        hid = hid * jax.nn.sigmoid(hid)
        g = jax.nn.sigmoid(jnp.dot(hid, w2t_ref[...],
                                   preferred_element_type=jnp.float32))  # (1, C)
        g_ref[...] = g[:, None, :]                                       # (1, 1, C)


def _se_apply_kernel(x_ref, g_ref, o_ref):
    # x_ref: (1, C, hw_tile); g_ref: (1, C, 1) f32
    o_ref[...] = x_ref[...] * g_ref[...].astype(o_ref.dtype)


# ----------------------------------------------------------------------------
# Wrappers.
# ----------------------------------------------------------------------------
def _vmem_capacity_bytes():
    try:
        cap = int(pltpu.get_tpu_info().vmem_capacity_bytes)
        if cap > 0:
            return cap
    except Exception:
        pass
    return 64 << 20  # conservative default = v7x per-TensorCore VMEM


def _se_batched(x2, w1t, w2t, *, block_budget, cap, w_bytes, hidden):
    B, C, HW = x2.shape
    itemsize = jnp.dtype(x2.dtype).itemsize
    slab_bytes = C * HW * itemsize

    # Block of roughly <= block_budget, but keep enough grid steps so each
    # TensorCore gets >= 4 pipelined steps (>= 8 total for a 2-TC v7x chip).
    bt = max(1, block_budget // max(slab_bytes, 1))
    min_steps = 8
    if B >= min_steps:
        bt = min(bt, max(1, B // min_steps))
    elif B >= 2:
        bt = min(bt, max(1, B // 2))
    bt = max(1, min(bt, B))
    grid = (pl.cdiv(B, bt),)   # ragged last batch block is fine (masked writes)

    needed = 4 * bt * slab_bytes + w_bytes + (4 << 20)
    vmem_limit = int(min(max(needed, 16 << 20), max(16 << 20, cap // 2)))

    cost = pl.CostEstimate(
        flops=int(2 * B * C * HW + 4 * B * C * hidden),
        transcendentals=int(B * (hidden + C)),
        bytes_accessed=int(2 * B * C * HW * itemsize + w_bytes),
    )

    return pl.pallas_call(
        functools.partial(_se_kernel, inv_hw=1.0 / HW),
        out_shape=jax.ShapeDtypeStruct((B, C, HW), x2.dtype),
        grid_spec=pltpu.PrefetchScalarGridSpec(
            num_scalar_prefetch=0,
            grid=grid,
            in_specs=[
                pl.BlockSpec((bt, C, HW), lambda b: (b, 0, 0)),   # x
                pl.BlockSpec((C, hidden), lambda b: (0, 0)),      # W1^T
                pl.BlockSpec((hidden, C), lambda b: (0, 0)),      # W2^T
            ],
            out_specs=pl.BlockSpec((bt, C, HW), lambda b: (b, 0, 0)),
        ),
        compiler_params=pltpu.CompilerParams(
            dimension_semantics=("parallel",),
            vmem_limit_bytes=vmem_limit,
        ),
        cost_estimate=cost,
    )(x2, w1t, w2t)


def _se_two_pass(x2, w1t, w2t, *, block_budget, cap, w_bytes, hidden):
    B, C, HW = x2.shape
    itemsize = jnp.dtype(x2.dtype).itemsize

    # TODO(synk): also tile C if a single (1, C, 128) tile exceeds the budget.
    hw_tile = (block_budget // max(C * itemsize, 1)) // 128 * 128
    hw_tile = min(max(128, hw_tile), HW)
    n_hw = pl.cdiv(HW, hw_tile)
    grid = (B, n_hw)

    needed = 4 * C * hw_tile * itemsize + w_bytes + (4 << 20)
    vmem_limit = int(min(max(needed, 16 << 20), max(16 << 20, cap // 2)))

    gate_cost = pl.CostEstimate(
        flops=int(B * C * HW + 4 * B * C * hidden),
        transcendentals=int(B * (hidden + C)),
        bytes_accessed=int(B * C * HW * itemsize + w_bytes),
    )
    gate = pl.pallas_call(
        functools.partial(_se_gate_kernel, inv_hw=1.0 / HW, hw=HW, hw_tile=hw_tile),
        out_shape=jax.ShapeDtypeStruct((B, 1, C), jnp.float32),
        grid_spec=pltpu.PrefetchScalarGridSpec(
            num_scalar_prefetch=0,
            grid=grid,
            in_specs=[
                pl.BlockSpec((1, C, hw_tile), lambda b, h: (b, 0, h)),
                pl.BlockSpec((C, hidden), lambda b, h: (0, 0)),
                pl.BlockSpec((hidden, C), lambda b, h: (0, 0)),
            ],
            out_specs=pl.BlockSpec((1, 1, C), lambda b, h: (b, 0, 0)),
            scratch_shapes=[pltpu.VMEM((1, C), jnp.float32)],
        ),
        compiler_params=pltpu.CompilerParams(
            dimension_semantics=("parallel", "arbitrary"),
            vmem_limit_bytes=vmem_limit,
        ),
        cost_estimate=gate_cost,
    )(x2, w1t, w2t)

    # Tiny (B, 1, C) -> (B, C, 1) transpose in XLA (negligible) so the apply
    # kernel gets a natural per-(b, c) broadcast over the lane axis.
    gate_t = jnp.transpose(gate, (0, 2, 1))

    apply_cost = pl.CostEstimate(
        flops=int(B * C * HW),
        transcendentals=0,
        bytes_accessed=int(2 * B * C * HW * itemsize + B * C * 4),
    )
    return pl.pallas_call(
        _se_apply_kernel,
        out_shape=jax.ShapeDtypeStruct((B, C, HW), x2.dtype),
        grid_spec=pltpu.PrefetchScalarGridSpec(
            num_scalar_prefetch=0,
            grid=grid,
            in_specs=[
                pl.BlockSpec((1, C, hw_tile), lambda b, h: (b, 0, h)),
                pl.BlockSpec((1, C, 1), lambda b, h: (b, 0, 0)),
            ],
            out_specs=pl.BlockSpec((1, C, hw_tile), lambda b, h: (b, 0, h)),
        ),
        compiler_params=pltpu.CompilerParams(
            dimension_semantics=("parallel", "parallel"),
            vmem_limit_bytes=vmem_limit,
        ),
        cost_estimate=apply_cost,
    )(x2, gate_t)


def squeeze_excitation(x, w1, w2, *, target_block_bytes=4 << 20):
    """x: (B, C, H, W); w1: (hidden, C); w2: (C, hidden) (PyTorch nn.Linear layout)."""
    B, C, H, W = x.shape
    hidden = w1.shape[0]
    HW = H * W
    itemsize = jnp.dtype(x.dtype).itemsize

    # Pure reshape (no pad, no extra HBM pass); the kernel uses the full HW
    # extent as its last block dim, which is legal for any HW.
    x2 = x.reshape(B, C, HW)

    # Pre-cast transposed weights to the f32 compute dtype in the wrapper.
    w1t = jnp.transpose(w1).astype(jnp.float32)   # (C, hidden)
    w2t = jnp.transpose(w2).astype(jnp.float32)   # (hidden, C)
    w_bytes = (w1t.size + w2t.size) * 4

    # Generation-aware per-block budget (in + out blocks, each double-buffered,
    # must fit in ~half of this chip's per-core VMEM together with weights).
    cap = _vmem_capacity_bytes()
    budget_cap = max(256 << 10, (cap // 2 - w_bytes - (4 << 20)) // 4)
    block_budget = max(1, min(target_block_bytes, budget_cap))

    slab_bytes = C * HW * itemsize
    if slab_bytes <= block_budget:
        out3 = _se_batched(x2, w1t, w2t, block_budget=block_budget, cap=cap,
                           w_bytes=w_bytes, hidden=hidden)
    else:
        out3 = _se_two_pass(x2, w1t, w2t, block_budget=block_budget, cap=cap,
                            w_bytes=w_bytes, hidden=hidden)
    return out3.reshape(B, C, H, W)


def _reference(x, w1, w2):
    mean = jnp.mean(x.astype(jnp.float32), axis=(2, 3))    # (B, C)
    h = mean @ w1.T.astype(jnp.float32)                    # (B, hidden)
    h = h * jax.nn.sigmoid(h)                              # SiLU
    g = jax.nn.sigmoid(h @ w2.T.astype(jnp.float32))       # (B, C)
    return (x * g[:, :, None, None].astype(x.dtype))


if __name__ == "__main__":
    # Module config: dim = C, shrinkage_rate = 0.25 -> hidden = int(C * 0.25)
    B, C, H, W = 2, 8, 16, 16
    hidden = int(C * 0.25)                                 # = 2

    key = jax.random.PRNGKey(0)
    kx, k1, k2 = jax.random.split(key, 3)

    x = jax.random.normal(kx, (B, C, H, W), dtype=jnp.float32)
    w1 = jax.random.normal(k1, (hidden, C), dtype=jnp.float32) * 0.1
    w2 = jax.random.normal(k2, (C, hidden), dtype=jnp.float32) * 0.1

    ref = _reference(x, w1, w2)

    # Main batched single-pass path.
    out = jax.block_until_ready(squeeze_excitation(x, w1, w2))
    assert out.shape == (B, C, H, W)
    assert jnp.allclose(out, ref, atol=1e-5, rtol=1e-5), "batched path mismatch"

    # Non-128-multiple spatial extent: no pad / no slice, full-extent lane dim.
    x_odd = jax.random.normal(kx, (B, C, 7, 9), dtype=jnp.float32)
    out_odd = jax.block_until_ready(squeeze_excitation(x_odd, w1, w2))
    assert jnp.allclose(out_odd, _reference(x_odd, w1, w2),
                        atol=1e-5, rtol=1e-5), "odd-HW path mismatch"

    # Exercise the HW-tiled two-pass fallback (huge-slab regime) at small shapes
    # by forcing a tiny per-block budget.
    out_tp = jax.block_until_ready(
        squeeze_excitation(x, w1, w2, target_block_bytes=2048))
    assert jnp.allclose(out_tp, ref, atol=1e-5, rtol=1e-5), "two-pass mismatch"

    print("KERNEL_OK")
</pallas_src>

<mosaic_0001>
module attributes {stable_mosaic.version = 11 : i64} {
  func.func @_se_kernel(%arg0: i32, %arg1: memref<1x8x256xf32, #tpu.memory_space<vmem>>, %arg2: memref<8x2xf32, #tpu.memory_space<vmem>>, %arg3: memref<2x8xf32, #tpu.memory_space<vmem>>, %arg4: memref<1x8x256xf32, #tpu.memory_space<vmem>>) attributes {dimension_semantics = [#tpu.dimension_semantics<parallel>], iteration_bounds = array<i64: 2>, scalar_prefetch = 0 : i64, scratch_operands = 0 : i64, tpu.core_type = #tpu.core_type<tc>, window_params = [{transform_indices = @transform_0, window_bounds = array<i64: 1, 8, 256>}, {pipeline_mode = #tpu.pipeline_mode<synchronous>, transform_indices = @transform_1, window_bounds = array<i64: 8, 2>}, {pipeline_mode = #tpu.pipeline_mode<synchronous>, transform_indices = @transform_2, window_bounds = array<i64: 2, 8>}, {transform_indices = @transform_3, window_bounds = array<i64: 1, 8, 256>}]} {
    %c0 = arith.constant 0 : index
    %c0_0 = arith.constant 0 : index
    %c0_1 = arith.constant 0 : index
    %0 = vector.load %arg1[%c0, %c0_0, %c0_1] : memref<1x8x256xf32, #tpu.memory_space<vmem>>, vector<1x8x256xf32>
    %cst = arith.constant dense<0.000000e+00> : vector<1x8xf32>
    %1 = vector.multi_reduction <add>, %0, %cst [2] : vector<1x8x256xf32> to vector<1x8xf32>
    %cst_2 = arith.constant 3.906250e-03 : f32
    %2 = vector.broadcast %cst_2 : f32 to vector<1x8xf32>
    %3 = arith.mulf %1, %2 : vector<1x8xf32>
    %c0_3 = arith.constant 0 : index
    %c0_4 = arith.constant 0 : index
    %4 = vector.load %arg2[%c0_3, %c0_4] : memref<8x2xf32, #tpu.memory_space<vmem>>, vector<8x2xf32>
    %cst_5 = arith.constant dense<0.000000e+00> : vector<1x2xf32>
    %5 = tpu.matmul %3, %4, %cst_5 {dimension_numbers = #tpu.dot_dimension_numbers<[1], [0], [0], [1], [0, 0, 1, 1], [], []>} : vector<1x8xf32>, vector<8x2xf32>, vector<1x2xf32> -> vector<1x2xf32>
    %6 = arith.negf %5 : vector<1x2xf32>
    %7 = math.exp %6 : vector<1x2xf32>
    %cst_6 = arith.constant 1.000000e+00 : f32
    %8 = vector.broadcast %cst_6 : f32 to vector<1x2xf32>
    %9 = arith.addf %8, %7 : vector<1x2xf32>
    %10 = arith.divf %8, %9 : vector<1x2xf32>
    %11 = arith.mulf %5, %10 : vector<1x2xf32>
    %c0_7 = arith.constant 0 : index
    %c0_8 = arith.constant 0 : index
    %12 = vector.load %arg3[%c0_7, %c0_8] : memref<2x8xf32, #tpu.memory_space<vmem>>, vector<2x8xf32>
    %cst_9 = arith.constant dense<0.000000e+00> : vector<1x8xf32>
    %13 = tpu.matmul %11, %12, %cst_9 {dimension_numbers = #tpu.dot_dimension_numbers<[1], [0], [0], [1], [0, 0, 1, 1], [], []>} : vector<1x2xf32>, vector<2x8xf32>, vector<1x8xf32> -> vector<1x8xf32>
    %14 = arith.negf %13 : vector<1x8xf32>
    %15 = math.exp %14 : vector<1x8xf32>
    %cst_10 = arith.constant 1.000000e+00 : f32
    %16 = vector.broadcast %cst_10 : f32 to vector<1x8xf32>
    %17 = arith.addf %16, %15 : vector<1x8xf32>
    %18 = arith.divf %16, %17 : vector<1x8xf32>
    %c0_11 = arith.constant 0 : index
    %c0_12 = arith.constant 0 : index
    %c0_13 = arith.constant 0 : index
    %19 = vector.load %arg1[%c0_11, %c0_12, %c0_13] : memref<1x8x256xf32, #tpu.memory_space<vmem>>, vector<1x8x256xf32>
    %20 = vector.shape_cast %18 : vector<1x8xf32> to vector<1x8x1xf32>
    %21 = vector.broadcast %20 : vector<1x8x1xf32> to vector<1x8x256xf32>
    %22 = arith.mulf %19, %21 : vector<1x8x256xf32>
    %c0_14 = arith.constant 0 : index
    %c0_15 = arith.constant 0 : index
    %c0_16 = arith.constant 0 : index
    %23 = vector.load %arg4[%c0_14, %c0_15, %c0_16] : memref<1x8x256xf32, #tpu.memory_space<vmem>>, vector<1x8x256xf32>
    tpu.vector_store %arg4[%c0_14, %c0_15, %c0_16], %22 {strides = array<i32>} : memref<1x8x256xf32, #tpu.memory_space<vmem>>, vector<1x8x256xf32>,
    return
  }
  func.func @transform_0(%arg0: i32) -> (i32, i32, i32) {
    %c0_i32 = arith.constant 0 : i32
    %c0_i32_0 = arith.constant 0 : i32
    %c0_i32_1 = arith.constant 0 : i32
    return %arg0, %c0_i32, %c0_i32_0 : i32, i32, i32
  }
  func.func @transform_1(%arg0: i32) -> (i32, i32) {
    %c0_i32 = arith.constant 0 : i32
    %c0_i32_0 = arith.constant 0 : i32
    %c0_i32_1 = arith.constant 0 : i32
    return %c0_i32, %c0_i32_0 : i32, i32
  }
  func.func @transform_2(%arg0: i32) -> (i32, i32) {
    %c0_i32 = arith.constant 0 : i32
    %c0_i32_0 = arith.constant 0 : i32
    %c0_i32_1 = arith.constant 0 : i32
    return %c0_i32, %c0_i32_0 : i32, i32
  }
  func.func @transform_3(%arg0: i32) -> (i32, i32, i32) {
    %c0_i32 = arith.constant 0 : i32
    %c0_i32_0 = arith.constant 0 : i32
    %c0_i32_1 = arith.constant 0 : i32
    return %arg0, %c0_i32, %c0_i32_0 : i32, i32, i32
  }
}

</mosaic_0001>

<bundles_post_ra>
// kernel: tpu_custom_call.1
= control target key start
LH: loop header
LB: loop body
LE: loop exit
PB: predicated region body
PF: predicated region fallthrough
CT: control target
= control target key end

     0   :  { %8 = vsyncpa [#allocation3], 0  ;;  %s828_s0 = inlined_call_operand.hbm [shape: f32[2,8,256], index: 0, kind: input, shape index: {}]   ;;  %s829_s1 = inlined_call_operand.vmem [shape: f32[8,2], index: 1, kind: input, shape index: {}]   ;;  %s830_s2 = inlined_call_operand.vmem [shape: f32[2,8], index: 2, kind: input, shape index: {}]   ;;  %s831_s3 = inlined_call_operand.hbm [shape: f32[2,8,256], index: 3, kind: output, shape index: {}]  }
   0x1   :  { %10 = vsyncpa [#allocation3 + $0x1], 0 }
   0x2   :  { %11 = vsyncpa [#allocation4], 0 }
   0x3   :  { %13 = vsyncpa [#allocation4 + $0x1], 0  ;;  %s671_s12 = smov 0   ;;  %s673_s13 = smov 0  }
   0x4   :  { %s675_s14 = smov 0   ;;  %s677_s15 = smov 0  }
   0x5 LB: > { %s692_s16 = sadd.s32 4294967295, %s645_s15   ;;  %s462_s17 = sadd.s32 4294967294, %s645_s15   ;;  %s645_s15 = sphi %s677_s15, %s848_s15   ;;  %s641_s14 = sphi %s675_s14, %s847_s14   ;;  %s637_s13 = sphi %s673_s13, %s846_s13   ;;  %s633_s12 = sphi %s671_s12, %s845_s12  }
   0x6   : > { %s696_s18 = sadd.s32 1, %s645_s15   ;;  %s26_s19 = sadd.s32 1, %s641_s14 }
   0x7   : > { %s23_s20 = ssub.s32 %s645_s15, %s696_s18  ;;  %p33_p0 = scmp.ne.s32.totalorder %s641_s14, %s637_s13 }
   0x8   : > { %p24_p1 = scmp.eq.s32.totalorder %s23_s20, 0  ;;  %p34_p2 = scmp.eq.s32.totalorder %s645_s15, 0 }
   0x9   : > { %p39_p3 = scmp.ne.s32.totalorder %s637_s13, %s633_s12  ;;  %p40_p4 = scmp.eq.s32.totalorder %s692_s16, 0 }
   0xa   : > { %s708_s21 = scalar_select %p24_p1, %s641_s14, %s26_s19  }
   0xb   : > { %p710_p5 = por %p34_p2, %p33_p0  ;;  %p714_p6 = por %p40_p4, %p39_p3 }
   0xc   : > { %p105_p7 = scmp.eq.s32.totalorder %s692_s16, 1  ;;  %p111_p8 = scmp.eq.s32.totalorder %s462_s17, 1 }
   0xd   : > { %s835_s23 = scalar_select %p714_p6, 1, 0 }
   0xe   : > { %p509_p10 = scmp.lt.s32.totalorder %s645_s15, 2  ;;  %p721_p11 = por %p105_p7, %p33_p0 }
   0xf   : > { %p725_p12 = por %p111_p8, %p39_p3  ;;  %s137_s26 = sand.u32 1, %s641_s14  }
  0x10   : > { %s836_s24 = scalar_select %p721_p11, 1, 0 }
  0x11   : > { %s837_s25 = scalar_select %p725_p12, 1, 0 }
  0x12   : > { %s481_s27 = sshll.u32 %s645_s15, 8  ;;  %s465_s28 = sshll.u32 %s137_s26, 4 }
  0x13   : > { %s734_s4 = scalar_lea.hbm %s828_s0, %s481_s27  ;;  %s141_s5 = scalar_lea.vmem [#allocation2], %s465_s28 }
  0x14   : > { %s149_s6 = sshll.u32 %s141_s5, 4  ;;  %p738_p13 = pnand %p509_p10, %p710_p5  ;;  %s742_s6 = int_to_ptr.vmem [resolvable:$true] %s149_s6 }
  0x15   : > { %s138_s8 = scalar_lea.sflag [#allocation3], %s137_s26  ;;  %s553_s9 = scalar_lea.hbm %s734_s4, 256 }
  0x16   : > { %p554_p2 = scmp.ne.s32.totalorder %s734_s4, %s553_s9  ;;  %p555_p3 = pneg %p738_p13 }
  0x17   : > { %s558_s17 = scalar_lea.hbm %s828_s0, 512  ;;  %p559_p5 = scmp.lt.s32.totalorder %s734_s4, %s828_s0 }
  0x18   : > { %p556_p4 = pnand %p555_p3, %p554_p2  ;;  %p560_p8 = scmp.lt.s32.totalorder %s558_s17, %s553_s9 }
  0x1a   : > { %p557_p7 = pneg %p556_p4  ;;  %p561_p10 = por %p560_p8, %p559_p5 }
  0x1c   : > { %p562_p9 = pnand %p561_p10, %p557_p7 }
  0x1e   : > { %565 = shalt.err (!%p562_p9)
}
  0x1f   : > { %s566_s22 = scalar_lea.vmem %s742_s6, 256  ;;  %s647_s26 = smov [#allocation2]  }
  0x20   : > { %p567_p0 = scmp.ne.s32.totalorder %s742_s6, %s566_s22  ;;  %s571_s27 = sshll.u32 %s647_s26, 4  ;;  %s572_s27 = int_to_ptr.vmem [resolvable:$false] %s571_s27 }
  0x21   : > { %s573_s28 = scalar_lea.vmem %s572_s27, 512  ;;  %p574_p4 = scmp.lt.s32.totalorder %s742_s6, %s572_s27 }
  0x22   : > { %p569_p1 = pnand %p567_p0, %p555_p3  ;;  %p575_p12 = scmp.lt.s32.totalorder %s573_s28, %s566_s22 }
  0x24   : > { %p570_p2 = pneg %p569_p1  ;;  %p576_p11 = por %p575_p12, %p574_p4 }
  0x26   : > { %p577_p6 = pnand %p576_p11, %p570_p2 }
  0x28   : > { %580 = shalt.err (!%p577_p6)
}
  0x29   : > { %504 = dma.hbm_to_vmem [thread:$0]  (!%p738_p13), %s734_s4, 256, %s742_s6, %s138_s8  }
  0x2a   : > { %p839_p9 = scmp.lt.s32.totalorder %s645_s15, 3  ;;  %p840_p7 = scmp.ge.s32.totalorder %s645_s15, 1 }
  0x2c   : > { %p155_p0 = pnand %p840_p7, %p839_p9 }
  0x2d   : > { %s769_s29 = sand.u32 (!%p155_p0), 1, %s637_s13   ;;  %p841_p6 = scmp.ne.s32.totalorder (!%p155_p0), %s835_s23, 0 }
  0x2e   : > { %158 = sbr.rel (%p155_p0) target bundleno = 781 (0x30d), region = 32  ;;  %s469_s30 = sshll.u32 (!%p155_p0), %s769_s29, 4 }
  0x2f   : > { %s161_s5 = scalar_lea.sflag (!%p155_p0), [#allocation3], %s769_s29  ;;  %s164_s7 = scalar_lea.vmem (!%p155_p0), [#allocation2], %s469_s30 }
  0x33   : > { %624 = dma.done.wait (%p841_p6), %s161_s5, 256  }
  0x34   : > { %626 = vsyncadd (%p841_p6), %s161_s5, 4294967040  ;;  %v187_v0 = vld [vmem:[%s164_s7] sm:$0xff]  ;;  %v188_v1 = vld [vmem:[%s164_s7 + $0x8] sm:$0xff]  ;;  %v648_v3 = vmov 0.0   ;;  %vm649_vm0 = vmmov 0   ;;  %v195_v5 = vlaneseq  ;;  %vm201_vm1 = vcmask 64512  }
  0x35   : > { %v189_v2 = vadd.f32 %v188_v1, %v187_v0  ;;  %487 = vmatprep.subr.mxu0 %v648_v3  ;;  %v193_v4 = vld [vmem:[%s829_s1] sm:$0xff]  ;;  %492 = vmatprep.subr.mxu1 %v648_v3  ;;  %vm286_vm2 = vcmask 1041408   ;;  %vm282_vm3 = vcmask 15360   ;;  %s482_s9 = sshll.u32 %s692_s16, 8  ;;  %s186_s10 = scalar_lea.vmem [#allocation5], %s469_s30 }
  0x36   : > { %488 = vmatpush3.msra.mxu0 %v193_v4  ;;  %489 = vmatprep.mubr.msk.f32.mxu0 %vm649_vm0, %v648_v3  ;;  %v196_v6 = vand.u32 127, %v195_v5  ;;  %v198_v7 = vshrl.u32 %v195_v5, 7  ;;  %v281_v12 = vld [vmem:[%s830_s2] sm:$0x3]  ;;  %s392_s11 = sshll.u32 %s186_s10, 4  ;;  %s791_s20 = scalar_lea.hbm %s831_s3, %s482_s9  ;;  %s393_s11 = int_to_ptr.vmem [resolvable:$true] %s392_s11 }
  0x37   : > { %190 = vadd.xlane.f32.xlu0 %v189_v2  ;;  %494 = vmatprep.mubr.msk.f32.mxu1 %vm649_vm0, %v648_v3  ;;  %s378_s22 = scalar_lea.sflag [#allocation4], %s769_s29  ;;  %s581_s26 = scalar_lea.vmem %s393_s11, 256 }
  0x38   : > { %v199_v8 = vsub.s32 %v196_v6, %v198_v7  ;;  %493 = vmatpush3.msk.msra.mxu1 %vm286_vm2, %v281_v12  ;;  %v368_v25 = vsub.s32 0, %v198_v7  ;;  %p582_p11 = scmp.ne.s32.totalorder %s393_s11, %s581_s26  ;;  %p842_p12 = scmp.ne.s32.totalorder %s836_s24, 0 }
  0x39   : > { %s650_s16 = smov [#allocation5]  }
  0x3a   : > { %p583_p13 = pnand %p582_p11, %p842_p12  ;;  %s585_s27 = sshll.u32 %s650_s16, 4  ;;  %s586_s27 = int_to_ptr.vmem [resolvable:$false] %s585_s27 }
  0x3b   : > { %s587_s28 = scalar_lea.vmem %s586_s27, 512  ;;  %p588_p3 = scmp.lt.s32.totalorder %s393_s11, %s586_s27 }
  0x3c   : > { %p584_p1 = pneg %p583_p13  ;;  %p589_p5 = scmp.lt.s32.totalorder %s587_s28, %s581_s26 }
  0x3e   : > { %p590_p8 = por %p589_p5, %p588_p3 }
  0x40   : > { %p591_p10 = pnand %p590_p8, %p584_p1 }
  0xc0   : > { %v191_v9 = vpop.xlane.xlu0 %190 }
  0xc1   : > { %v192_v10 = vmul.f32 0.00390625, %v191_v9 }
  0xc3   : > { %v200_v11 = vrot.slane %v192_v10, %v199_v8 }
  0xc5   : > { %490 = vmatmul.mubr.msk.f32.vlgmr.msra.gmra.mxu0 %vm201_vm1, %v200_v11 }
 0x185   : > { %v270_v13 = vpop.f32.mrf.mxu0 }
 0x186   : > { %v472_v14 = vmul.f32 -1.442695, %v270_v13 }
 0x187   : > { %v491_v15 = vpop.f32.mrf.mxu0 }
 0x188   : > { %545 = vpow2.f32 %v472_v14 }
 0x195   : > { %v546_v16 = vpop.eup %545 }
 0x196   : > { %v277_v17 = vadd.f32 1.0, %v546_v16 }
 0x198   : > { %547 = vrcp.f32 %v277_v17 }
 0x1a5   : > { %v548_v18 = vpop.eup %547 }
 0x1a6   : > { %v280_v19 = vmul.f32 %v548_v18, %v270_v13 }
 0x1a8   : > { %495 = vmatmul.mubr.msk.f32.vlgmr.msra.gmra.mxu1 %vm282_vm3, %v280_v19 }
 0x268   : > { %v356_v20 = vpop.f32.mrf.mxu1 }
 0x269   : > { %v475_v21 = vmul.f32 -1.442695, %v356_v20 }
 0x26a   : > { %v496_v22 = vpop.f32.mrf.mxu1 }
 0x26b   : > { %549 = vpow2.f32 %v475_v21 }
 0x278   : > { %v550_v23 = vpop.eup %549 }
 0x279   : > { %v363_v24 = vadd.f32 1.0, %v550_v23 }
 0x27b   : > { %551 = vrcp.f32 %v363_v24 }
 0x288   : > { %v552_v26 = vpop.eup %551 }
 0x289   : > { %v369_v27 = vrot.slane %v552_v26, %v368_v25 }
 0x28b   : > { %371 = vbcast.lane.b32.xlu0 %v369_v27, 256 }
 0x2fd   : > { %v372_v28 = vpop.permute.xlu0 %371 }
 0x2fe   : > { %v373_v29 = vmul.f32 %v372_v28, %v187_v0  ;;  %v374_v30 = vmul.f32 %v372_v28, %v188_v1 }
 0x300   : > { %375 = vst [vmem:[%s186_s10] sm:$0xff] %v373_v29  ;;  %376 = vst [vmem:[%s186_s10 + $0x8] sm:$0xff] %v374_v30 }
 0x301   : > { %594 = shalt.err (!%p591_p10)
}
 0x302   : > { %s595_s30 = scalar_lea.hbm %s791_s20, 256  ;;  %s599_s7 = scalar_lea.hbm %s831_s3, 512 }
 0x303   : > { %p596_p2 = scmp.ne.s32.totalorder %s791_s20, %s595_s30  ;;  %p600_p7 = scmp.lt.s32.totalorder %s791_s20, %s831_s3 }
 0x304   : > { %p601_p0 = scmp.lt.s32.totalorder %s599_s7, %s595_s30 }
 0x305   : > { %p597_p4 = pnand %p596_p2, %p842_p12 }
 0x306   : > { %p602_p6 = por %p601_p0, %p600_p7 }
 0x307   : > { %p598_p9 = pneg %p597_p4 }
 0x309   : > { %p603_p11 = pnand %p602_p6, %p598_p9 }
 0x30b   : > { %606 = shalt.err (!%p603_p11)
}
 0x30c   : > { %499 = dma.vmem_to_hbm [thread:$0]  (%p842_p12), %s393_s11, 256, %s791_s20, %s378_s22  }
 0x30d PF: > { %s404_s23 = sand.u32 1, %s633_s12   ;;  %p843_p13 = scmp.ne.s32.totalorder %s837_s25, 0 }
 0x30e   : > { %p844_p1 = scmp.ge.s32.totalorder %s645_s15, 2  ;;  %s405_s8 = scalar_lea.sflag [#allocation4], %s404_s23 }
 0x310   : > { %p506_p3 = pnand %p844_p1, %p843_p13 }
 0x312   : > { %p507_p5 = pneg %p506_p3 }
 0x314   : > { %628 = dma.done.wait (%p507_p5), %s405_s8, 256  }
 0x315   : > { %630 = vsyncadd (%p507_p5), %s405_s8, 4294967040  ;;  %p16_p8 = scmp.ge.s32.totalorder %s696_s18, 4   ;;  %s845_s12 = smov %s637_s13 }
 0x316   : > { %s846_s13 = smov %s641_s14  ;;  %s847_s14 = smov %s708_s21 }
 0x317   : > { %s848_s15 = smov %s696_s18  ;;  %18 = sbr.rel (!%p16_p8) target bundleno = 5 (0x5), region = 77 }
 0x31c   :  { %410 = vsyncpa [#allocation3], 1 }
 0x31d   :  { %412 = vsyncpa [#allocation3 + $0x1], 1 }
 0x31e   :  { %413 = vsyncpa [#allocation4], 1 }
 0x31f   :  { %415 = vsyncpa [#allocation4 + $0x1], 1 }

</bundles_post_ra>
